<compile_context>
chip_gen: v7x
topology: tpu7x:2x2x1
jax: 0.10.0
libtpu: 0.0.40
codegen_flags: <defaults>
</compile_context>

<pallas_src>
import functools

import jax
import jax.numpy as jnp
from jax.experimental import pallas as pl
from jax.experimental.pallas import tpu as pltpu


def _round_up(v, m):
    return ((v + m - 1) // m) * m


def bank_mlp_kernel(x_ref, w1t_ref, b1_ref, w2t_ref, b2_ref, o_ref):
    # x_ref : (TB, F_in)    w1t_ref: (F_in, H)   b1_ref: (1, H)
    # w2t_ref: (H, 1)       b2_ref : (1, 1) scalar in SMEM
    # o_ref : (TB, 1)
    h = jnp.dot(x_ref[...], w1t_ref[...],
                preferred_element_type=jnp.float32)            # (TB, H) on MXU
    h = jnp.maximum(h + b1_ref[...], 0.0)                      # bias + ReLU (VPU, f32)
    y = jnp.dot(h, w2t_ref[...].astype(jnp.float32),
                preferred_element_type=jnp.float32)            # (TB, 1) on MXU
    y = y + b2_ref[0, 0]                                       # scalar bias from SMEM
    o_ref[...] = jax.nn.sigmoid(y).astype(o_ref.dtype)         # EUP sigmoid


@functools.partial(jax.jit, static_argnames=("tb",))
def bank_mlp_forward(x, w1, b1, w2, b2, *, tb=4096):
    """BankMLP forward pass.

    Args (PyTorch layouts):
      x : (B, F_in=51)
      w1: (H, F_in)   fc1.weight      b1: (H,)   fc1.bias
      w2: (1, H)      fc2.weight      b2: (1,)   fc2.bias
    Returns: (B, 1) float32, matching the PyTorch module.
    """
    B, F_in = x.shape
    H = w1.shape[0]

    # Batch tile on the sublane axis: multiple of 8 (or covers the whole batch).
    TB = _round_up(min(tb, B), 8)
    n_tiles = pl.cdiv(B, TB)

    # Tiny weight reshapes/transposes (done once per call, negligible).
    w1t = jnp.transpose(w1).astype(x.dtype)         # (F_in, H) - standard MXU form
    w2t = jnp.transpose(w2).astype(jnp.float32)     # (H, 1)
    b1r = b1.reshape(1, H).astype(jnp.float32)      # broadcast over rows
    b2r = b2.reshape(1, 1).astype(jnp.float32)      # scalar -> SMEM

    out = pl.pallas_call(
        bank_mlp_kernel,
        out_shape=jax.ShapeDtypeStruct((B, 1), jnp.float32),
        grid_spec=pltpu.PrefetchScalarGridSpec(
            num_scalar_prefetch=0,
            grid=(n_tiles,),
            in_specs=[
                pl.BlockSpec((TB, F_in), lambda i: (i, 0)),         # x tile, pipelined DMA
                pl.BlockSpec((F_in, H), lambda i: (0, 0)),          # W1^T, VMEM-resident
                pl.BlockSpec((1, H), lambda i: (0, 0)),             # b1
                pl.BlockSpec((H, 1), lambda i: (0, 0)),             # W2^T
                pl.BlockSpec(memory_space=pltpu.MemorySpace.SMEM),  # b2 scalar
            ],
            out_specs=pl.BlockSpec((TB, 1), lambda i: (i, 0)),
        ),
        compiler_params=pltpu.CompilerParams(
            dimension_semantics=("parallel",)),                     # megacore batch split
    )(x, w1t, b1r, w2t, b2r)

    return out


def init_bank_mlp_params(key, input_size=51, hidden=32, output_size=1):
    """nn.Linear-style init: U(-1/sqrt(fan_in), +1/sqrt(fan_in)); PyTorch layouts."""
    k1, k2, k3, k4 = jax.random.split(key, 4)
    bound1 = 1.0 / jnp.sqrt(input_size)
    bound2 = 1.0 / jnp.sqrt(hidden)
    w1 = jax.random.uniform(k1, (hidden, input_size), jnp.float32, -bound1, bound1)
    b1 = jax.random.uniform(k2, (hidden,), jnp.float32, -bound1, bound1)
    w2 = jax.random.uniform(k3, (output_size, hidden), jnp.float32, -bound2, bound2)
    b2 = jax.random.uniform(k4, (output_size,), jnp.float32, -bound2, bound2)
    return w1, b1, w2, b2


def reference_forward(x, w1, b1, w2, b2):
    h = jnp.maximum(x @ w1.T + b1, 0.0)
    return jax.nn.sigmoid(h @ w2.T + b2)


# TODO(synk): training/inference drivers (_fit / Adam / BCELoss / _predict
# thresholding) are host-side orchestration in the PyTorch class and are not
# part of the forward-pass kernel.

if __name__ == "__main__":
    key = jax.random.PRNGKey(0)
    kx, kx2, kp = jax.random.split(key, 3)

    input_size = 51   # fixed by BankMLP
    hidden = 32       # hidden_layer_size
    output_size = 1

    w1, b1, w2, b2 = init_bank_mlp_params(kp, input_size, hidden, output_size)

    # --- small batch, single tile ---
    batch = 8
    x = jax.random.normal(kx, (batch, input_size), jnp.float32)
    out = jax.block_until_ready(bank_mlp_forward(x, w1, b1, w2, b2))
    ref = reference_forward(x, w1, b1, w2, b2)
    assert out.shape == (batch, output_size)
    assert jnp.allclose(out, ref, atol=1e-5, rtol=1e-5)

    # --- multi-tile grid with a ragged trailing block (B not divisible by TB) ---
    batch2 = 300
    x2 = jax.random.normal(kx2, (batch2, input_size), jnp.float32)
    out2 = jax.block_until_ready(bank_mlp_forward(x2, w1, b1, w2, b2, tb=128))
    ref2 = reference_forward(x2, w1, b1, w2, b2)
    assert out2.shape == (batch2, output_size)
    assert jnp.allclose(out2, ref2, atol=1e-5, rtol=1e-5)

    # --- single block larger than the (ragged) batch, default tile size ---
    out3 = jax.block_until_ready(bank_mlp_forward(x2, w1, b1, w2, b2))
    assert jnp.allclose(out3, ref2, atol=1e-5, rtol=1e-5)

    print("KERNEL_OK")
</pallas_src>

<mosaic_0001>
module attributes {stable_mosaic.version = 11 : i64} {
  func.func @bank_mlp_kernel(%arg0: i32, %arg1: memref<8x51xf32, #tpu.memory_space<vmem>>, %arg2: memref<51x32xf32, #tpu.memory_space<vmem>>, %arg3: memref<1x32xf32, #tpu.memory_space<vmem>>, %arg4: memref<32x1xf32, #tpu.memory_space<vmem>>, %arg5: memref<1x1xf32, #tpu.memory_space<smem>>, %arg6: memref<8x1xf32, #tpu.memory_space<vmem>>) attributes {dimension_semantics = [#tpu.dimension_semantics<parallel>], iteration_bounds = array<i64: 1>, scalar_prefetch = 0 : i64, scratch_operands = 0 : i64, tpu.core_type = #tpu.core_type<tc>, window_params = [{transform_indices = @transform_0, window_bounds = array<i64: 8, 51>}, {pipeline_mode = #tpu.pipeline_mode<synchronous>, transform_indices = @transform_1, window_bounds = array<i64: 51, 32>}, {pipeline_mode = #tpu.pipeline_mode<synchronous>, transform_indices = @transform_2, window_bounds = array<i64: 1, 32>}, {pipeline_mode = #tpu.pipeline_mode<synchronous>, transform_indices = @transform_3, window_bounds = array<i64: 32, 1>}, {transform_indices = @transform_4, window_bounds = array<i64: 1, 1>}, {transform_indices = @transform_5, window_bounds = array<i64: 8, 1>}]} {
    %c0 = arith.constant 0 : index
    %c0_0 = arith.constant 0 : index
    %0 = vector.load %arg1[%c0, %c0_0] : memref<8x51xf32, #tpu.memory_space<vmem>>, vector<8x51xf32>
    %c0_1 = arith.constant 0 : index
    %c0_2 = arith.constant 0 : index
    %1 = vector.load %arg2[%c0_1, %c0_2] : memref<51x32xf32, #tpu.memory_space<vmem>>, vector<51x32xf32>
    %cst = arith.constant dense<0.000000e+00> : vector<8x32xf32>
    %2 = tpu.matmul %0, %1, %cst {dimension_numbers = #tpu.dot_dimension_numbers<[1], [0], [0], [1], [0, 0, 1, 1], [], []>} : vector<8x51xf32>, vector<51x32xf32>, vector<8x32xf32> -> vector<8x32xf32>
    %c0_3 = arith.constant 0 : index
    %c0_4 = arith.constant 0 : index
    %3 = vector.load %arg3[%c0_3, %c0_4] : memref<1x32xf32, #tpu.memory_space<vmem>>, vector<1x32xf32>
    %4 = vector.broadcast %3 : vector<1x32xf32> to vector<8x32xf32>
    %5 = arith.addf %2, %4 : vector<8x32xf32>
    %cst_5 = arith.constant 0.000000e+00 : f32
    %6 = vector.broadcast %cst_5 : f32 to vector<8x32xf32>
    %7 = arith.maximumf %5, %6 : vector<8x32xf32>
    %c0_6 = arith.constant 0 : index
    %c0_7 = arith.constant 0 : index
    %8 = vector.load %arg4[%c0_6, %c0_7] : memref<32x1xf32, #tpu.memory_space<vmem>>, vector<32x1xf32>
    %cst_8 = arith.constant dense<0.000000e+00> : vector<8x1xf32>
    %9 = tpu.matmul %7, %8, %cst_8 {dimension_numbers = #tpu.dot_dimension_numbers<[1], [0], [0], [1], [0, 0, 1, 1], [], []>} : vector<8x32xf32>, vector<32x1xf32>, vector<8x1xf32> -> vector<8x1xf32>
    %c0_9 = arith.constant 0 : index
    %c0_10 = arith.constant 0 : index
    %10 = memref.load %arg5[%c0_9, %c0_10] : memref<1x1xf32, #tpu.memory_space<smem>>
    %11 = vector.broadcast %10 : f32 to vector<8x1xf32>
    %12 = arith.addf %9, %11 : vector<8x1xf32>
    %13 = arith.negf %12 : vector<8x1xf32>
    %14 = math.exp %13 : vector<8x1xf32>
    %cst_11 = arith.constant 1.000000e+00 : f32
    %15 = vector.broadcast %cst_11 : f32 to vector<8x1xf32>
    %16 = arith.addf %15, %14 : vector<8x1xf32>
    %17 = arith.divf %15, %16 : vector<8x1xf32>
    %c0_12 = arith.constant 0 : index
    %c0_13 = arith.constant 0 : index
    %18 = vector.load %arg6[%c0_12, %c0_13] : memref<8x1xf32, #tpu.memory_space<vmem>>, vector<8x1xf32>
    tpu.vector_store %arg6[%c0_12, %c0_13], %17 {strides = array<i32>} : memref<8x1xf32, #tpu.memory_space<vmem>>, vector<8x1xf32>,
    return
  }
  func.func @transform_0(%arg0: i32) -> (i32, i32) {
    %c0_i32 = arith.constant 0 : i32
    %c0_i32_0 = arith.constant 0 : i32
    return %arg0, %c0_i32 : i32, i32
  }
  func.func @transform_1(%arg0: i32) -> (i32, i32) {
    %c0_i32 = arith.constant 0 : i32
    %c0_i32_0 = arith.constant 0 : i32
    %c0_i32_1 = arith.constant 0 : i32
    return %c0_i32, %c0_i32_0 : i32, i32
  }
  func.func @transform_2(%arg0: i32) -> (i32, i32) {
    %c0_i32 = arith.constant 0 : i32
    %c0_i32_0 = arith.constant 0 : i32
    %c0_i32_1 = arith.constant 0 : i32
    return %c0_i32, %c0_i32_0 : i32, i32
  }
  func.func @transform_3(%arg0: i32) -> (i32, i32) {
    %c0_i32 = arith.constant 0 : i32
    %c0_i32_0 = arith.constant 0 : i32
    %c0_i32_1 = arith.constant 0 : i32
    return %c0_i32, %c0_i32_0 : i32, i32
  }
  func.func @transform_4(%arg0: i32) -> (i32, i32) {
    %c0_i32 = arith.constant 0 : i32
    %c0_i32_0 = arith.constant 0 : i32
    %c0_i32_1 = arith.constant 0 : i32
    return %c0_i32, %c0_i32_0 : i32, i32
  }
  func.func @transform_5(%arg0: i32) -> (i32, i32) {
    %c0_i32 = arith.constant 0 : i32
    %c0_i32_0 = arith.constant 0 : i32
    return %arg0, %c0_i32 : i32, i32
  }
}

</mosaic_0001>

<bundles_post_ra>
// kernel: bank_mlp_forward.1
= control target key start
LH: loop header
LB: loop body
LE: loop exit
PB: predicated region body
PF: predicated region fallthrough
CT: control target
= control target key end

     0   :  { %v275_v0 = vmov 0.0|0.0   ;;  %vm276_vm0 = vmmov 0   ;;  %v277_v4 = vmov 0.0   ;;  %vm40_vm1 = vcmask 1042432   ;;  %s353_s1 = inlined_call_operand.vmem [shape: f32[51,32], index: 1, kind: input, shape index: {}]   ;;  %s354_s3 = inlined_call_operand.vmem [shape: f32[32,1], index: 3, kind: input, shape index: {}]   ;;  %s355_s0 = inlined_call_operand.vmem [shape: f32[8,51], index: 0, kind: input, shape index: {}]   ;;  %s356_s2 = inlined_call_operand.vmem [shape: f32[1,32], index: 2, kind: input, shape index: {}]   ;;  %s357_s4 = inlined_call_operand.<no memory space> [shape: f32[1,1], index: 4, kind: input, shape index: {}]   ;;  %s358_s5 = inlined_call_operand.vmem [shape: f32[8,1], index: 5, kind: output, shape index: {}]  }
   0x1   :  { %253 = vmatprep.subr.bf16.mxu0 %v275_v0  ;;  %v22_v1 = vld [vmem:[%s353_s1] sm:$0xff]  ;;  %v23_v2 = vld [vmem:[%s353_s1 + $0x8] sm:$0xff]  ;;  %v24_v3 = vld [vmem:[%s353_s1 + $0x10] sm:$0xff]  ;;  %239 = vmatprep.mubr.msk.f32.mxu0 %vm276_vm0, %v277_v4  ;;  %vm36_vm2 = vcmask 416768   ;;  %vm121_vm3 = vcmask 261120   ;;  %v120_v24 = vstv %s357_s4  ;;  %vm201_vm4 = vcmask 7168  }
   0x2   :  { %v254_v5 = vpack.c.bf16 %v23_v2, %v22_v1  ;;  %v25_v6 = vld [vmem:[%s353_s1 + $0x18] sm:$0xff]  ;;  %262 = vmatprep.subr.bf16.mxu1 %v275_v0  ;;  %250 = vmatprep.mubr.msk.f32.mxu1 %vm276_vm0, %v277_v4  ;;  %v115_v7 = vld [vmem:[%s354_s3] sm:$0xff]  ;;  %v116_v9 = vld [vmem:[%s354_s3 + $0x8] sm:$0xff] }
   0x3   :  { %v257_v8 = vpack.c.bf16 %v25_v6, %v24_v3  ;;  %v26_v10 = vld [vmem:[%s353_s1 + $0x20] sm:$0xff]  ;;  %v27_v11 = vld [vmem:[%s353_s1 + $0x28] sm:$0xff]  ;;  %v263_v12 = vpack.c.bf16 %v116_v9, %v115_v7  ;;  %v28_v14 = vld [vmem:[%s353_s1 + $0x30] sm:$0x7] }
   0x4   :  { %255 = vmatpush3.bf16.msra.mxu0 %v254_v5  ;;  %v260_v13 = vpack.c.bf16 %v27_v11, %v26_v10  ;;  %v21_v15 = vld [vmem:[%s355_s0] sm:$0xff]  ;;  %v117_v16 = vld [vmem:[%s354_s3 + $0x10] sm:$0xff]  ;;  %v118_v17 = vld [vmem:[%s354_s3 + $0x18] sm:$0xff] }
   0x5   :  { %256 = vmatprep.subr.bf16.mxu0 %v275_v0  ;;  %264 = vmatpush3.bf16.msra.mxu1 %v263_v12  ;;  %v266_v18 = vpack.c.bf16 %v118_v17, %v117_v16  ;;  %v207_v19 = vld [vmem:[%s356_s2] ss:$0 sm:$0xff] }
   0x6   :  { %265 = vmatprep.subr.bf16.mxu1 %v275_v0 }
   0x8   :  { %258 = vmatpush3.bf16.msra.mxu0 %v257_v8 }
   0x9   :  { %259 = vmatprep.subr.bf16.mxu0 %v275_v0  ;;  %267 = vmatpush3.bf16.msra.mxu1 %v266_v18 }
   0xc   :  { %261 = vmatpush3.bf16.msra.mxu0 %v260_v13 }
   0xd   :  { %237 = vmatprep.subr.mxu0 %v277_v4 }
  0x10   :  { %238 = vmatpush3.msk.msra.mxu0 %vm40_vm1, %v28_v14 }
  0x11   :  { %240 = vmatmul.mubr.msk.f32.vlgmr.msra.gmra.mrb[0].mxu0 %vm36_vm2, %v21_v15 }
  0xe4   :  { %v110_v20 = vpop.f32.mrb[0].mxu0 }
  0xe5   :  { %v111_v21 = vadd.f32 %v207_v19, %v110_v20  ;;  %v241_v22 = vpop.f32.mrb[1].mxu0 }
  0xe7   :  { %v114_v23 = vmax.f32 %v111_v21, 0.0 }
  0xe9   :  { %251 = vmatmul.mubr.msk.f32.vlgmr.msra.gmra.mrb[0].mxu1 %vm121_vm3, %v114_v23 }
 0x1bc   :  { %v191_v25 = vpop.f32.mrb[0].mxu1 }
 0x1bd   :  { %v192_v26 = vadd.f32 %v191_v25, %v120_v24  ;;  %v252_v27 = vpop.f32.mrb[1].mxu1 }
 0x1bf   :  { %v211_v28 = vmul.f32 -1.442695, %v192_v26 }
 0x1c1   :  { %271 = vpow2.f32 %v211_v28 }
 0x1cb   :  { %v272_v29 = vpop.eup %271 }
 0x1cc   :  { %v198_v30 = vadd.f32 1.0, %v272_v29 }
 0x1ce   :  { %273 = vrcp.f32 %v198_v30 }
 0x1d8   :  { %v274_v31 = vpop.eup %273 }
 0x1d9   :  { %202 = vst.msk [vmem:[%s358_s5] sm:$0xff] %vm201_vm4, %v274_v31 }

</bundles_post_ra>
